<compile_context>
chip_gen: v7x
topology: tpu7x:2x2x1
jax: 0.10.0
libtpu: 0.0.40
codegen_flags: <defaults>
</compile_context>

<pallas_src>
import functools

import jax
import jax.numpy as jnp
from jax.experimental import pallas as pl
from jax.experimental.pallas import tpu as pltpu

NEG_BIG = -1e30  # bias for padded logit columns -> exp() == 0 -> prob == 0


def categorical_dist_kernel(x_ref, w1_ref, b1_ref, w2_ref, b2_ref,
                            wl_ref, bl_ref, triu_ref, u_ref,
                            probs_ref, action_ref, *, n_actions):
    # x_ref: [TB, D_pad] bf16; weights bf16; biases f32; triu: [A_pad, A_pad] f32;
    # u_ref: [TB, 1] f32.
    x = x_ref[...]

    # hidden layer 0: relu(x @ W1 + b1)   (bf16 MXU inputs, f32 accumulate)
    h = jnp.dot(x, w1_ref[...], preferred_element_type=jnp.float32) + b1_ref[...]
    h = jnp.maximum(h, 0.0).astype(jnp.bfloat16)

    # hidden layer 1: relu(h @ W2 + b2)
    h = jnp.dot(h, w2_ref[...], preferred_element_type=jnp.float32) + b2_ref[...]
    h = jnp.maximum(h, 0.0).astype(jnp.bfloat16)

    # last layer logits (padded columns carry a -1e30 bias)
    logits = jnp.dot(h, wl_ref[...], preferred_element_type=jnp.float32) + bl_ref[...]

    # numerically stable softmax numerators over the 128-wide padded action axis (f32)
    m = jnp.max(logits, axis=-1, keepdims=True)
    e = jnp.exp(logits - m)                               # padded cols -> exactly 0

    # Unnormalized inclusive prefix sum along the action axis as ONE 128x128 matmul
    # on the otherwise-idle MXU (instead of an XLU cumsum).  Its last column is the
    # total mass, so the denominator comes for free (no extra lane reduction).
    cdf = jnp.dot(e, triu_ref[...], preferred_element_type=jnp.float32)
    denom = cdf[:, -1:]                                   # [TB, 1]

    # Exact normalization only for the emitted probs (rows sum to 1 within f32 eps).
    probs_ref[...] = (e / denom).astype(probs_ref.dtype)

    # Inverse-CDF sampling on UNNORMALIZED sums: index = #(cdf < u * denom),
    # clamped to the valid action range to guard fp rounding.
    thresh = u_ref[...] * denom                           # [TB, 1]
    sel = jnp.sum((cdf < thresh).astype(jnp.int32), axis=-1, keepdims=True)
    sel = jnp.minimum(sel, n_actions - 1)
    action_ref[...] = jnp.broadcast_to(sel, action_ref.shape)   # small (TB, 8) store


def _round_up(n, m):
    return ((n + m - 1) // m) * m


def categorical_dist_forward(x, params, u, *, tb=1024, min_grid_steps=1,
                             probs_dtype=jnp.float32):
    """x: [B, D_in] f32; u: [B, 1] uniform(0,1) f32.

    Returns (action [B] i32, probs [B, A] probs_dtype).
    Set min_grid_steps=2 on v7x so both TensorCores get grid steps for B <= tb.
    """
    w1, b1, w2, b2, wl, bl = params
    B, d_in = x.shape
    h1, h2, a = w1.shape[1], w2.shape[1], wl.shape[1]

    # lane padding (128) for all feature dims (128, not 256: this kernel is
    # overhead/HBM-bound, widening the MXU passes would only waste work)
    d_p, h1_p, h2_p, a_p = (_round_up(s, 128) for s in (d_in, h1, h2, a))

    # batch tiling: pick step count first so the last tile is mostly full
    n_steps = max(pl.cdiv(B, tb), min_grid_steps)
    TB = _round_up(pl.cdiv(B, n_steps), 8)
    B_p = _round_up(B, TB)

    def pad2(m, r, c, fill=0.0):
        return jnp.pad(m, ((0, r - m.shape[0]), (0, c - m.shape[1])),
                       constant_values=fill)

    x_p = pad2(x, B_p, d_p).astype(jnp.bfloat16)
    u_p = jnp.pad(u, ((0, B_p - B), (0, 0)))
    w1_p = pad2(w1, d_p, h1_p).astype(jnp.bfloat16)
    b1_p = pad2(b1, 1, h1_p)
    w2_p = pad2(w2, h1_p, h2_p).astype(jnp.bfloat16)
    b2_p = pad2(b2, 1, h2_p)
    wl_p = pad2(wl, h2_p, a_p).astype(jnp.bfloat16)
    # padded logit columns: huge negative bias so softmax prob is exactly zero
    if a_p > a:
        bl_p = jnp.concatenate(
            [bl, jnp.full((1, a_p - a), NEG_BIG, jnp.float32)], axis=1)
    else:
        bl_p = bl
    # upper-triangular ones (incl. diagonal) -> inclusive prefix sum via matmul
    triu = jnp.triu(jnp.ones((a_p, a_p), jnp.float32))

    def row_spec(shape):   # per-batch-tile blocks
        return pl.BlockSpec(shape, lambda i: (i, 0))

    def pin_spec(shape):   # VMEM-resident across all grid steps (constant index_map)
        return pl.BlockSpec(shape, lambda i: (0, 0))

    kernel = functools.partial(categorical_dist_kernel, n_actions=a)

    probs_p, action_p = pl.pallas_call(
        kernel,
        out_shape=(
            jax.ShapeDtypeStruct((B_p, a_p), probs_dtype),
            jax.ShapeDtypeStruct((B_p, 8), jnp.int32),
        ),
        grid=(B_p // TB,),
        in_specs=[
            row_spec((TB, d_p)),
            pin_spec((d_p, h1_p)), pin_spec((1, h1_p)),
            pin_spec((h1_p, h2_p)), pin_spec((1, h2_p)),
            pin_spec((h2_p, a_p)), pin_spec((1, a_p)),
            pin_spec((a_p, a_p)),
            row_spec((TB, 1)),
        ],
        out_specs=(row_spec((TB, a_p)), row_spec((TB, 8))),
        compiler_params=pltpu.CompilerParams(
            dimension_semantics=("parallel",),
            # TB=1024 peaks at ~4 MiB of tile VMEM + ~300 KiB pinned weights;
            # comfortably under 32 MiB scoped / 64 MiB physical on v7x.
            vmem_limit_bytes=32 * 1024 * 1024,
        ),
    )(x_p, w1_p, b1_p, w2_p, b2_p, wl_p, bl_p, triu, u_p)

    return action_p[:B, 0], probs_p[:B, :a]


def init_params(key, input_size, hidden_sizes, output_size):
    """Deterministic parameter init mirroring the module's shapes.

    Hidden layers: uniform init (stand-in for PyTorch default Linear init).
    Last layer: xavier_uniform weight, zero bias (init_layer_xavier).
    Weights stored [in, out]; biases [1, out].
    """
    sizes = [input_size] + list(hidden_sizes)
    params = []
    for i in range(len(hidden_sizes)):
        key, kw, kb = jax.random.split(key, 3)
        fan_in, fan_out = sizes[i], sizes[i + 1]
        bound = (1.0 / fan_in) ** 0.5
        w = jax.random.uniform(kw, (fan_in, fan_out), jnp.float32, -bound, bound)
        b = jax.random.uniform(kb, (1, fan_out), jnp.float32, -bound, bound)
        params += [w, b]
    # last layer: xavier uniform, zero bias
    key, kw = jax.random.split(key)
    fan_in, fan_out = hidden_sizes[-1], output_size
    gain_bound = (6.0 / (fan_in + fan_out)) ** 0.5
    wl = jax.random.uniform(kw, (fan_in, fan_out), jnp.float32, -gain_bound, gain_bound)
    bl = jnp.zeros((1, fan_out), jnp.float32)
    params += [wl, bl]
    return tuple(params)


def _reference_probs(x, params):
    """Pure-JAX f32 reference of the forward pass (probs only)."""
    w1, b1, w2, b2, wl, bl = params
    h = jnp.maximum(x @ w1 + b1, 0.0)
    h = jnp.maximum(h @ w2 + b2, 0.0)
    logits = h @ wl + bl
    return jax.nn.softmax(logits, axis=-1)


if __name__ == "__main__":
    B = 2
    input_size = 4
    hidden_sizes = [32, 32]
    output_size = 6  # number of categories / actions

    root = jax.random.PRNGKey(0)
    k_param, k_x, k_u = jax.random.split(root, 3)

    params = init_params(k_param, input_size, hidden_sizes, output_size)
    x = jax.random.normal(k_x, (B, input_size), jnp.float32)
    u = jax.random.uniform(k_u, (B, 1), jnp.float32)  # sampling randomness

    action, probs = categorical_dist_forward(x, params, u)
    jax.block_until_ready((action, probs))

    # sanity: probs rows sum to ~1 (exact f32 normalization), actions in range,
    # probs close to an f32 reference despite bf16 MXU inputs.
    assert probs.shape == (B, output_size)
    assert action.shape == (B,)
    assert bool(jnp.all(jnp.abs(jnp.sum(probs, axis=-1) - 1.0) < 1e-3))
    assert bool(jnp.all((action >= 0) & (action < output_size)))
    ref = _reference_probs(x, params)
    assert bool(jnp.all(jnp.abs(probs - ref) < 5e-2))

    print("KERNEL_OK")
</pallas_src>

<mosaic_0001>
module attributes {stable_mosaic.version = 11 : i64} {
  func.func @categorical_dist_kernel(%arg0: i32, %arg1: memref<8x128xbf16, #tpu.memory_space<vmem>>, %arg2: memref<128x128xbf16, #tpu.memory_space<vmem>>, %arg3: memref<1x128xf32, #tpu.memory_space<vmem>>, %arg4: memref<128x128xbf16, #tpu.memory_space<vmem>>, %arg5: memref<1x128xf32, #tpu.memory_space<vmem>>, %arg6: memref<128x128xbf16, #tpu.memory_space<vmem>>, %arg7: memref<1x128xf32, #tpu.memory_space<vmem>>, %arg8: memref<128x128xf32, #tpu.memory_space<vmem>>, %arg9: memref<8x1xf32, #tpu.memory_space<vmem>>, %arg10: memref<8x128xf32, #tpu.memory_space<vmem>>, %arg11: memref<8x8xi32, #tpu.memory_space<vmem>>) attributes {dimension_semantics = [#tpu.dimension_semantics<parallel>], iteration_bounds = array<i64: 1>, scalar_prefetch = 0 : i64, scratch_operands = 0 : i64, tpu.core_type = #tpu.core_type<tc>, window_params = [{transform_indices = @transform_0, window_bounds = array<i64: 8, 128>}, {pipeline_mode = #tpu.pipeline_mode<synchronous>, transform_indices = @transform_1, window_bounds = array<i64: 128, 128>}, {pipeline_mode = #tpu.pipeline_mode<synchronous>, transform_indices = @transform_2, window_bounds = array<i64: 1, 128>}, {pipeline_mode = #tpu.pipeline_mode<synchronous>, transform_indices = @transform_3, window_bounds = array<i64: 128, 128>}, {pipeline_mode = #tpu.pipeline_mode<synchronous>, transform_indices = @transform_4, window_bounds = array<i64: 1, 128>}, {pipeline_mode = #tpu.pipeline_mode<synchronous>, transform_indices = @transform_5, window_bounds = array<i64: 128, 128>}, {pipeline_mode = #tpu.pipeline_mode<synchronous>, transform_indices = @transform_6, window_bounds = array<i64: 1, 128>}, {pipeline_mode = #tpu.pipeline_mode<synchronous>, transform_indices = @transform_7, window_bounds = array<i64: 128, 128>}, {transform_indices = @transform_8, window_bounds = array<i64: 8, 1>}, {transform_indices = @transform_9, window_bounds = array<i64: 8, 128>}, {transform_indices = @transform_10, window_bounds = array<i64: 8, 8>}]} {
    %c0 = arith.constant 0 : index
    %c0_0 = arith.constant 0 : index
    %0 = vector.load %arg1[%c0, %c0_0] : memref<8x128xbf16, #tpu.memory_space<vmem>>, vector<8x128xbf16>
    %c0_1 = arith.constant 0 : index
    %c0_2 = arith.constant 0 : index
    %1 = vector.load %arg2[%c0_1, %c0_2] : memref<128x128xbf16, #tpu.memory_space<vmem>>, vector<128x128xbf16>
    %cst = arith.constant dense<0.000000e+00> : vector<8x128xf32>
    %2 = tpu.matmul %0, %1, %cst {dimension_numbers = #tpu.dot_dimension_numbers<[1], [0], [0], [1], [0, 0, 1, 1], [], []>} : vector<8x128xbf16>, vector<128x128xbf16>, vector<8x128xf32> -> vector<8x128xf32>
    %c0_3 = arith.constant 0 : index
    %c0_4 = arith.constant 0 : index
    %3 = vector.load %arg3[%c0_3, %c0_4] : memref<1x128xf32, #tpu.memory_space<vmem>>, vector<1x128xf32>
    %4 = vector.broadcast %3 : vector<1x128xf32> to vector<8x128xf32>
    %5 = arith.addf %2, %4 : vector<8x128xf32>
    %cst_5 = arith.constant 0.000000e+00 : f32
    %6 = vector.broadcast %cst_5 : f32 to vector<8x128xf32>
    %7 = arith.maximumf %5, %6 : vector<8x128xf32>
    %8 = arith.truncf %7 : vector<8x128xf32> to vector<8x128xbf16>
    %c0_6 = arith.constant 0 : index
    %c0_7 = arith.constant 0 : index
    %9 = vector.load %arg4[%c0_6, %c0_7] : memref<128x128xbf16, #tpu.memory_space<vmem>>, vector<128x128xbf16>
    %cst_8 = arith.constant dense<0.000000e+00> : vector<8x128xf32>
    %10 = tpu.matmul %8, %9, %cst_8 {dimension_numbers = #tpu.dot_dimension_numbers<[1], [0], [0], [1], [0, 0, 1, 1], [], []>} : vector<8x128xbf16>, vector<128x128xbf16>, vector<8x128xf32> -> vector<8x128xf32>
    %c0_9 = arith.constant 0 : index
    %c0_10 = arith.constant 0 : index
    %11 = vector.load %arg5[%c0_9, %c0_10] : memref<1x128xf32, #tpu.memory_space<vmem>>, vector<1x128xf32>
    %12 = vector.broadcast %11 : vector<1x128xf32> to vector<8x128xf32>
    %13 = arith.addf %10, %12 : vector<8x128xf32>
    %cst_11 = arith.constant 0.000000e+00 : f32
    %14 = vector.broadcast %cst_11 : f32 to vector<8x128xf32>
    %15 = arith.maximumf %13, %14 : vector<8x128xf32>
    %16 = arith.truncf %15 : vector<8x128xf32> to vector<8x128xbf16>
    %c0_12 = arith.constant 0 : index
    %c0_13 = arith.constant 0 : index
    %17 = vector.load %arg6[%c0_12, %c0_13] : memref<128x128xbf16, #tpu.memory_space<vmem>>, vector<128x128xbf16>
    %cst_14 = arith.constant dense<0.000000e+00> : vector<8x128xf32>
    %18 = tpu.matmul %16, %17, %cst_14 {dimension_numbers = #tpu.dot_dimension_numbers<[1], [0], [0], [1], [0, 0, 1, 1], [], []>} : vector<8x128xbf16>, vector<128x128xbf16>, vector<8x128xf32> -> vector<8x128xf32>
    %c0_15 = arith.constant 0 : index
    %c0_16 = arith.constant 0 : index
    %19 = vector.load %arg7[%c0_15, %c0_16] : memref<1x128xf32, #tpu.memory_space<vmem>>, vector<1x128xf32>
    %20 = vector.broadcast %19 : vector<1x128xf32> to vector<8x128xf32>
    %21 = arith.addf %18, %20 : vector<8x128xf32>
    %cst_17 = arith.constant dense<0xFF800000> : vector<8xf32>
    %22 = vector.multi_reduction <maximumf>, %21, %cst_17 [1] : vector<8x128xf32> to vector<8xf32>
    %23 = vector.shape_cast %22 : vector<8xf32> to vector<8x1xf32>
    %24 = vector.broadcast %23 : vector<8x1xf32> to vector<8x128xf32>
    %25 = arith.subf %21, %24 : vector<8x128xf32>
    %26 = math.exp %25 : vector<8x128xf32>
    %c0_18 = arith.constant 0 : index
    %c0_19 = arith.constant 0 : index
    %27 = vector.load %arg8[%c0_18, %c0_19] : memref<128x128xf32, #tpu.memory_space<vmem>>, vector<128x128xf32>
    %cst_20 = arith.constant dense<0.000000e+00> : vector<8x128xf32>
    %28 = tpu.matmul %26, %27, %cst_20 {dimension_numbers = #tpu.dot_dimension_numbers<[1], [0], [0], [1], [0, 0, 1, 1], [], []>} : vector<8x128xf32>, vector<128x128xf32>, vector<8x128xf32> -> vector<8x128xf32>
    %29 = vector.extract_strided_slice %28 {offsets = [0, 127], sizes = [8, 1], strides = [1, 1]} : vector<8x128xf32> to vector<8x1xf32>
    %30 = vector.broadcast %29 : vector<8x1xf32> to vector<8x128xf32>
    %31 = arith.divf %26, %30 : vector<8x128xf32>
    %c0_21 = arith.constant 0 : index
    %c0_22 = arith.constant 0 : index
    %32 = vector.load %arg10[%c0_21, %c0_22] : memref<8x128xf32, #tpu.memory_space<vmem>>, vector<8x128xf32>
    tpu.vector_store %arg10[%c0_21, %c0_22], %31 {strides = array<i32>} : memref<8x128xf32, #tpu.memory_space<vmem>>, vector<8x128xf32>,
    %c0_23 = arith.constant 0 : index
    %c0_24 = arith.constant 0 : index
    %33 = vector.load %arg9[%c0_23, %c0_24] : memref<8x1xf32, #tpu.memory_space<vmem>>, vector<8x1xf32>
    %34 = arith.mulf %33, %29 : vector<8x1xf32>
    %35 = vector.broadcast %34 : vector<8x1xf32> to vector<8x128xf32>
    %36 = arith.cmpf olt, %28, %35 : vector<8x128xf32>
    %37 = arith.extui %36 : vector<8x128xi1> to vector<8x128xi32>
    %cst_25 = arith.constant dense<0> : vector<8xi32>
    %38 = vector.multi_reduction <add>, %37, %cst_25 [1] : vector<8x128xi32> to vector<8xi32>
    %39 = vector.shape_cast %38 : vector<8xi32> to vector<8x1xi32>
    %c5_i32 = arith.constant 5 : i32
    %40 = vector.broadcast %c5_i32 : i32 to vector<8x1xi32>
    %41 = arith.minsi %39, %40 : vector<8x1xi32>
    %42 = vector.shape_cast %41 : vector<8x1xi32> to vector<8x1xi32>
    %43 = vector.broadcast %42 : vector<8x1xi32> to vector<8x8xi32>
    %c0_26 = arith.constant 0 : index
    %c0_27 = arith.constant 0 : index
    %44 = vector.load %arg11[%c0_26, %c0_27] : memref<8x8xi32, #tpu.memory_space<vmem>>, vector<8x8xi32>
    tpu.vector_store %arg11[%c0_26, %c0_27], %43 {strides = array<i32>} : memref<8x8xi32, #tpu.memory_space<vmem>>, vector<8x8xi32>,
    return
  }
  func.func @transform_0(%arg0: i32) -> (i32, i32) {
    %c0_i32 = arith.constant 0 : i32
    %c0_i32_0 = arith.constant 0 : i32
    return %arg0, %c0_i32 : i32, i32
  }
  func.func @transform_1(%arg0: i32) -> (i32, i32) {
    %c0_i32 = arith.constant 0 : i32
    %c0_i32_0 = arith.constant 0 : i32
    %c0_i32_1 = arith.constant 0 : i32
    return %c0_i32, %c0_i32_0 : i32, i32
  }
  func.func @transform_2(%arg0: i32) -> (i32, i32) {
    %c0_i32 = arith.constant 0 : i32
    %c0_i32_0 = arith.constant 0 : i32
    %c0_i32_1 = arith.constant 0 : i32
    return %c0_i32, %c0_i32_0 : i32, i32
  }
  func.func @transform_3(%arg0: i32) -> (i32, i32) {
    %c0_i32 = arith.constant 0 : i32
    %c0_i32_0 = arith.constant 0 : i32
    %c0_i32_1 = arith.constant 0 : i32
    return %c0_i32, %c0_i32_0 : i32, i32
  }
  func.func @transform_4(%arg0: i32) -> (i32, i32) {
    %c0_i32 = arith.constant 0 : i32
    %c0_i32_0 = arith.constant 0 : i32
    %c0_i32_1 = arith.constant 0 : i32
    return %c0_i32, %c0_i32_0 : i32, i32
  }
  func.func @transform_5(%arg0: i32) -> (i32, i32) {
    %c0_i32 = arith.constant 0 : i32
    %c0_i32_0 = arith.constant 0 : i32
    %c0_i32_1 = arith.constant 0 : i32
    return %c0_i32, %c0_i32_0 : i32, i32
  }
  func.func @transform_6(%arg0: i32) -> (i32, i32) {
    %c0_i32 = arith.constant 0 : i32
    %c0_i32_0 = arith.constant 0 : i32
    %c0_i32_1 = arith.constant 0 : i32
    return %c0_i32, %c0_i32_0 : i32, i32
  }
  func.func @transform_7(%arg0: i32) -> (i32, i32) {
    %c0_i32 = arith.constant 0 : i32
    %c0_i32_0 = arith.constant 0 : i32
    %c0_i32_1 = arith.constant 0 : i32
    return %c0_i32, %c0_i32_0 : i32, i32
  }
  func.func @transform_8(%arg0: i32) -> (i32, i32) {
    %c0_i32 = arith.constant 0 : i32
    %c0_i32_0 = arith.constant 0 : i32
    return %arg0, %c0_i32 : i32, i32
  }
  func.func @transform_9(%arg0: i32) -> (i32, i32) {
    %c0_i32 = arith.constant 0 : i32
    %c0_i32_0 = arith.constant 0 : i32
    return %arg0, %c0_i32 : i32, i32
  }
  func.func @transform_10(%arg0: i32) -> (i32, i32) {
    %c0_i32 = arith.constant 0 : i32
    %c0_i32_0 = arith.constant 0 : i32
    return %arg0, %c0_i32 : i32, i32
  }
}

</mosaic_0001>

<bundles_post_ra>
// kernel: tpu_custom_call.1
= control target key start
LH: loop header
LB: loop body
LE: loop exit
PB: predicated region body
PF: predicated region fallthrough
CT: control target
= control target key end

     0   :  { %16 = vsyncpa [#allocation3], 0  ;;  %s1180_s0 = inlined_call_operand.vmem [shape: bf16[8,128], index: 0, kind: input, shape index: {}]   ;;  %s1181_s1 = inlined_call_operand.hbm [shape: bf16[128,128], index: 1, kind: input, shape index: {}]   ;;  %s1182_s2 = inlined_call_operand.vmem [shape: f32[1,128], index: 2, kind: input, shape index: {}]   ;;  %s1183_s3 = inlined_call_operand.hbm [shape: bf16[128,128], index: 3, kind: input, shape index: {}]   ;;  %s1184_s4 = inlined_call_operand.vmem [shape: f32[1,128], index: 4, kind: input, shape index: {}]   ;;  %s1185_s5 = inlined_call_operand.hbm [shape: bf16[128,128], index: 5, kind: input, shape index: {}]   ;;  %s1186_s6 = inlined_call_operand.vmem [shape: f32[1,128], index: 6, kind: input, shape index: {}]   ;;  %s1187_s7 = inlined_call_operand.hbm [shape: f32[128,128], index: 7, kind: input, shape index: {}]   ;;  %s1188_s8 = inlined_call_operand.vmem [shape: f32[8,1], index: 8, kind: input, shape index: {}]   ;;  %s1189_s9 = inlined_call_operand.hbm [shape: f32[8,128], index: 9, kind: output, shape index: {0}]   ;;  %s1190_s10 = inlined_call_operand.hbm [shape: s32[8,8], index: 10, kind: output, shape index: {1}]  }
   0x1   :  { %17 = vsyncpa [#allocation6], 0 }
   0x2   :  { %18 = vsyncpa [#allocation9], 0 }
   0x3   :  { %19 = vsyncpa [#allocation4], 0 }
   0x4   :  { %20 = vsyncpa [#allocation12], 0  ;;  %s967_s13 = smov [#allocation5]   ;;  %s968_s15 = smov [#allocation2]  }
   0x5   :  { %s42_s14 = sshll.u32 %s967_s13, 4  ;;  %s28_s16 = sshll.u32 %s968_s15, 4  ;;  %s43_s14 = int_to_ptr.vmem [resolvable:$true] %s42_s14  ;;  %s1038_s16 = int_to_ptr.vmem [resolvable:$true] %s28_s16 }
   0x6   :  { %s825_s19 = scalar_lea.hbm %s1183_s3, 1024 }
   0x7   :  { %p826_p0 = scmp.ne.s32.totalorder %s1183_s3, %s825_s19  ;;  %p829_p1 = scmp.lt.u32.totalorder %s825_s19, %s1183_s3 }
   0x9   :  { %p831_p2 = pnand %p829_p1, %p826_p0 }
   0xb   :  { %834 = shalt.err (!%p831_p2)
}
   0xc   :  { %s835_s24 = scalar_lea.vmem %s43_s14, 1024  ;;  %p840_p4 = scmp.lt.s32.totalorder %s43_s14, %s43_s14 }
   0xd   :  { %p836_p3 = scmp.ne.s32.totalorder %s43_s14, %s835_s24  ;;  %p841_p5 = scmp.lt.s32.totalorder %s835_s24, %s835_s24 }
   0xf   :  { %p842_p6 = por %p841_p5, %p840_p4 }
  0x11   :  { %p843_p7 = pnand %p842_p6, %p836_p3 }
  0x13   :  { %846 = shalt.err (!%p843_p7)
}
  0x14   :  { %s969_s25 = smov 64   ;;  %s970_s26 = smov 4  }
  0x15   :  { %48 = dma.hbm_to_vmem [thread:$0]  %s1183_s3, 1024, %s43_s14, [#allocation6], %s969_s25, %s969_s25, %s970_s26  }
  0x16   :  { %s847_s11 = scalar_lea.hbm %s1181_s1, 1024 }
  0x17   :  { %p848_p8 = scmp.ne.s32.totalorder %s1181_s1, %s847_s11  ;;  %p851_p9 = scmp.lt.u32.totalorder %s847_s11, %s1181_s1 }
  0x19   :  { %p853_p10 = pnand %p851_p9, %p848_p8 }
  0x1b   :  { %856 = shalt.err (!%p853_p10)
}
  0x1c   :  { %s857_s18 = scalar_lea.vmem %s1038_s16, 1024  ;;  %p862_p12 = scmp.lt.s32.totalorder %s1038_s16, %s1038_s16 }
  0x1d   :  { %p858_p11 = scmp.ne.s32.totalorder %s1038_s16, %s857_s18  ;;  %p863_p13 = scmp.lt.s32.totalorder %s857_s18, %s857_s18 }
  0x1f   :  { %p864_p0 = por %p863_p13, %p862_p12 }
  0x21   :  { %p865_p1 = pnand %p864_p0, %p858_p11 }
  0x23   :  { %868 = shalt.err (!%p865_p1)
}
  0x24   :  { %34 = dma.hbm_to_vmem [thread:$0]  %s1181_s1, 1024, %s1038_s16, [#allocation3], %s969_s25, %s969_s25, %s970_s26  }
  0x25   :  { %s971_s19 = smov [#allocation7]   ;;  %s972_s21 = smov [#allocation8]  }
  0x26   :  { %s56_s20 = sshll.u32 %s971_s19, 4  ;;  %s70_s22 = sshll.u32 %s972_s21, 4  ;;  %s57_s20 = int_to_ptr.vmem [resolvable:$true] %s56_s20  ;;  %s1075_s22 = int_to_ptr.vmem [resolvable:$true] %s70_s22 }
  0x27   :  { %s869_s27 = scalar_lea.hbm %s1185_s5, 1024 }
  0x28   :  { %p870_p2 = scmp.ne.s32.totalorder %s1185_s5, %s869_s27  ;;  %p873_p3 = scmp.lt.u32.totalorder %s869_s27, %s1185_s5 }
  0x2a   :  { %p875_p4 = pnand %p873_p3, %p870_p2 }
  0x2c   :  { %878 = shalt.err (!%p875_p4)
}
  0x2d   :  { %s879_s1 = scalar_lea.vmem %s57_s20, 1024  ;;  %p884_p6 = scmp.lt.s32.totalorder %s57_s20, %s57_s20 }
  0x2e   :  { %p880_p5 = scmp.ne.s32.totalorder %s57_s20, %s879_s1  ;;  %p885_p7 = scmp.lt.s32.totalorder %s879_s1, %s879_s1 }
  0x30   :  { %p886_p8 = por %p885_p7, %p884_p6 }
  0x32   :  { %p887_p9 = pnand %p886_p8, %p880_p5 }
  0x34   :  { %890 = shalt.err (!%p887_p9)
}
  0x35   :  { %62 = dma.hbm_to_vmem [thread:$0]  %s1185_s5, 1024, %s57_s20, [#allocation6], %s969_s25, %s969_s25, %s970_s26  }
  0x36   :  { %s891_s17 = scalar_lea.hbm %s1187_s7, 2048 }
  0x37   :  { %p892_p10 = scmp.ne.s32.totalorder %s1187_s7, %s891_s17  ;;  %p895_p11 = scmp.lt.u32.totalorder %s891_s17, %s1187_s7 }
  0x39   :  { %p897_p12 = pnand %p895_p11, %p892_p10 }
  0x3b   :  { %900 = shalt.err (!%p897_p12)
}
  0x3c   :  { %s901_s21 = scalar_lea.vmem %s1075_s22, 2048  ;;  %p906_p0 = scmp.lt.s32.totalorder %s1075_s22, %s1075_s22 }
  0x3d   :  { %p902_p13 = scmp.ne.s32.totalorder %s1075_s22, %s901_s21  ;;  %p907_p1 = scmp.lt.s32.totalorder %s901_s21, %s901_s21 }
  0x3f   :  { %p908_p2 = por %p907_p1, %p906_p0 }
  0x41   :  { %p909_p3 = pnand %p908_p2, %p902_p13 }
  0x43   :  { %912 = shalt.err (!%p909_p3)
}
  0x44   :  { %s973_s5 = smov 128   ;;  %s974_s25 = smov 8  }
  0x45   :  { %76 = dma.hbm_to_vmem [thread:$0]  %s1187_s7, 2048, %s1075_s22, [#allocation9], %s973_s5, %s973_s5, %s974_s25  }
  0x46   :  { %957 = dma.done.wait [#allocation3], 1024  }
  0x47   :  { %958 = vsyncadd [#allocation3], 4294966272 }
  0x48   :  { %959 = dma.done.wait [#allocation6], 2048  }
  0x49   :  { %960 = vsyncadd [#allocation6], 4294965248 }
  0x4a   :  { %961 = dma.done.wait [#allocation9], 2048  }
  0x4b   :  { %962 = vsyncadd [#allocation9], 4294965248  ;;  %v975_v0 = vmov 0.0   ;;  %vm976_vm0 = vmmov 0   ;;  %v797_v1 = vld [vmem:[#allocation2] sm:$0xff]   ;;  %v798_v2 = vld [vmem:[#allocation2 + $0x8] sm:$0xff]  }
  0x4c   :  { %659 = vmatprep.subr.bf16.mxu0 %v975_v0  ;;  %675 = vmatprep.mubr.msk.bf16.mxu0 %vm976_vm0, %v975_v0  ;;  %v799_v3 = vld [vmem:[#allocation2 + $0x10] sm:$0xff]   ;;  %v805_v4 = vld [vmem:[#allocation5] sm:$0xff]   ;;  %v800_v5 = vld [vmem:[#allocation2 + $0x18] sm:$0xff]   ;;  %v977_v45 = vmov 0.0|0.0   ;;  %s981_s30 = smov [#allocation10]  }
  0x4d   :  { %679 = vmatprep.subr.bf16.mxu1 %v975_v0  ;;  %695 = vmatprep.mubr.msk.bf16.mxu1 %vm976_vm0, %v975_v0  ;;  %v806_v6 = vld [vmem:[#allocation5 + $0x8] sm:$0xff]   ;;  %v801_v7 = vld [vmem:[#allocation2 + $0x20] sm:$0xff]   ;;  %v807_v8 = vld [vmem:[#allocation5 + $0x10] sm:$0xff]   ;;  %s563_s11 = sshll.u32 %s981_s30, 4  ;;  %s564_s11 = int_to_ptr.vmem [resolvable:$true] %s563_s11 }
  0x4e   :  { %660 = vmatpush3.bf16.msra.mxu0 %v797_v1  ;;  %680 = vmatpush3.bf16.msra.mxu1 %v805_v4  ;;  %v802_v9 = vld [vmem:[#allocation2 + $0x28] sm:$0xff]   ;;  %v808_v10 = vld [vmem:[#allocation5 + $0x18] sm:$0xff]   ;;  %v803_v11 = vld [vmem:[#allocation2 + $0x30] sm:$0xff]   ;;  %p918_p5 = scmp.lt.s32.totalorder %s564_s11, %s564_s11 }
  0x4f   :  { %661 = vmatprep.subr.bf16.mxu0 %v975_v0  ;;  %681 = vmatprep.subr.bf16.mxu1 %v975_v0  ;;  %v809_v12 = vld [vmem:[#allocation5 + $0x20] sm:$0xff]   ;;  %v804_v13 = vld [vmem:[#allocation2 + $0x38] sm:$0xff]   ;;  %v810_v14 = vld [vmem:[#allocation5 + $0x28] sm:$0xff]  }
  0x50   :  { %v92_v15 = vld [vmem:[%s1180_s0] sm:$0xf]  ;;  %v811_v16 = vld [vmem:[#allocation5 + $0x30] sm:$0xff]   ;;  %v812_v17 = vld [vmem:[#allocation5 + $0x38] sm:$0xff]  }
  0x51   :  { %v813_v18 = vld [vmem:[#allocation7] sm:$0xff]   ;;  %v814_v19 = vld [vmem:[#allocation7 + $0x8] sm:$0xff]   ;;  %v815_v20 = vld [vmem:[#allocation7 + $0x10] sm:$0xff]  }
  0x52   :  { %662 = vmatpush3.bf16.msra.mxu0 %v798_v2  ;;  %682 = vmatpush3.bf16.msra.mxu1 %v806_v6  ;;  %v816_v21 = vld [vmem:[#allocation7 + $0x18] sm:$0xff]   ;;  %v817_v22 = vld [vmem:[#allocation7 + $0x20] sm:$0xff]   ;;  %v818_v23 = vld [vmem:[#allocation7 + $0x28] sm:$0xff]  }
  0x53   :  { %663 = vmatprep.subr.bf16.mxu0 %v975_v0  ;;  %683 = vmatprep.subr.bf16.mxu1 %v975_v0  ;;  %v588_v24 = vld [vmem:[%s1182_s2] ss:$0 sm:$0xff]  ;;  %v819_v32 = vld [vmem:[#allocation7 + $0x30] sm:$0xff]   ;;  %v820_v33 = vld [vmem:[#allocation7 + $0x38] sm:$0xff]  }
  0x54   :  { %v597_v34 = vld [vmem:[%s1184_s4] ss:$0 sm:$0xff]  ;;  %v436_v43 = vld [vmem:[#allocation8 + $0x8] sm:$0xff]  ;;  %v437_v44 = vld [vmem:[#allocation8 + $0x10] sm:$0xff] }
  0x55   :  { %v435_v42 = vld [vmem:[#allocation8] sm:$0xff]  ;;  %v438_v47 = vld [vmem:[#allocation8 + $0x18] sm:$0xff]  ;;  %v440_v50 = vld [vmem:[#allocation8 + $0x28] sm:$0xff] }
  0x56   :  { %664 = vmatpush3.bf16.msra.mxu0 %v799_v3  ;;  %684 = vmatpush3.bf16.msra.mxu1 %v807_v8  ;;  %v755_v46 = vpack.c.bf16 %v436_v43, %v435_v42  ;;  %v758_v48 = vpack.c.bf16 %v438_v47, %v437_v44  ;;  %v439_v49 = vld [vmem:[#allocation8 + $0x20] sm:$0xff]  ;;  %v441_v52 = vld [vmem:[#allocation8 + $0x30] sm:$0xff]  ;;  %v442_v53 = vld [vmem:[#allocation8 + $0x38] sm:$0xff] }
  0x57   :  { %665 = vmatprep.subr.bf16.mxu0 %v975_v0  ;;  %685 = vmatprep.subr.bf16.mxu1 %v975_v0  ;;  %v761_v51 = vpack.c.bf16 %v440_v50, %v439_v49  ;;  %v764_v54 = vpack.c.bf16 %v442_v53, %v441_v52  ;;  %v606_v55 = vld [vmem:[%s1186_s6] ss:$0 sm:$0xff]  ;;  %v444_v62 = vld [vmem:[#allocation8 + $0x48] sm:$0xff]  ;;  %v446_v1 = vld [vmem:[#allocation8 + $0x58] sm:$0xff]  ;;  %s980_s6 = smov 1  }
  0x58   :  { %v443_v61 = vld [vmem:[#allocation8 + $0x40] sm:$0xff]  ;;  %v448_v4 = vld [vmem:[#allocation8 + $0x68] sm:$0xff]  ;;  %v449_v6 = vld [vmem:[#allocation8 + $0x70] sm:$0xff] }
  0x59   :  { %v767_v63 = vpack.c.bf16 %v444_v62, %v443_v61  ;;  %v447_v3 = vld [vmem:[#allocation8 + $0x60] sm:$0xff] }
  0x5a   :  { %666 = vmatpush3.bf16.msra.mxu0 %v800_v5  ;;  %686 = vmatpush3.bf16.msra.mxu1 %v808_v10  ;;  %v773_v5 = vpack.c.bf16 %v448_v4, %v447_v3 }
  0x5b   :  { %667 = vmatprep.subr.bf16.mxu0 %v975_v0  ;;  %687 = vmatprep.subr.bf16.mxu1 %v975_v0 }
  0x5e   :  { %668 = vmatpush3.bf16.msra.mxu0 %v801_v7  ;;  %688 = vmatpush3.bf16.msra.mxu1 %v809_v12  ;;  %v450_v7 = vld [vmem:[#allocation8 + $0x78] sm:$0xff] }
  0x5f   :  { %669 = vmatprep.subr.bf16.mxu0 %v975_v0  ;;  %689 = vmatprep.subr.bf16.mxu1 %v975_v0  ;;  %v776_v8 = vpack.c.bf16 %v450_v7, %v449_v6 }
  0x62   :  { %670 = vmatpush3.bf16.msra.mxu0 %v802_v9  ;;  %690 = vmatpush3.bf16.msra.mxu1 %v810_v14  ;;  %v979_v14 = vmov 0  }
  0x63   :  { %671 = vmatprep.subr.bf16.mxu0 %v975_v0  ;;  %691 = vmatprep.subr.bf16.mxu1 %v975_v0 }
  0x64   :  { %794 = vset.pattern.permute.xlu1 %v979_v14 }
  0x66   :  { %672 = vmatpush3.bf16.msra.mxu0 %v803_v11  ;;  %692 = vmatpush3.bf16.msra.mxu1 %v811_v16 }
  0x67   :  { %673 = vmatprep.subr.bf16.mxu0 %v975_v0  ;;  %693 = vmatprep.subr.bf16.mxu1 %v975_v0 }
  0x6a   :  { %674 = vmatpush3.bf16.msra.mxu0 %v804_v13  ;;  %694 = vmatpush3.bf16.msra.mxu1 %v812_v17  ;;  %v978_v13 = vmov 127   ;;  %v529_v17 = vld [vmem:[%s1188_s8] sm:$0xff]  ;;  %s913_s8 = scalar_lea.vmem %s564_s11, 128 }
  0x6b   :  { %699 = vmatprep.subr.bf16.mxu0 %v975_v0  ;;  %754 = vmatprep.subr.bf16.mxu1 %v977_v45  ;;  %p914_p4 = scmp.ne.s32.totalorder %s564_s11, %s913_s8  ;;  %p919_p6 = scmp.lt.s32.totalorder %s913_s8, %s913_s8 }
  0x6c   :  { %795 = vset.pattern.permute.xlu0 %v978_v13 }
  0x6d   :  { %676 = vmatmul.mubr.bf16.vlgmr.msra.gmra.mrb[0].mxu0 %v92_v15  ;;  %p920_p7 = por %p919_p6, %p918_p5 }
  0x6e   :  { %715 = vmatprep.mubr.msk.bf16.mxu0 %vm976_vm0, %v975_v0  ;;  %700 = vmatpush3.bf16.msra.mxu0 %v813_v18 }
  0x6f   :  { %701 = vmatprep.subr.bf16.mxu0 %v975_v0  ;;  %p921_p8 = pnand %p920_p7, %p914_p4 }
  0x72   :  { %702 = vmatpush3.bf16.msra.mxu0 %v814_v19 }
  0x73   :  { %703 = vmatprep.subr.bf16.mxu0 %v975_v0 }
  0x76   :  { %704 = vmatpush3.bf16.msra.mxu0 %v815_v20 }
  0x77   :  { %705 = vmatprep.subr.bf16.mxu0 %v975_v0 }
  0x7a   :  { %706 = vmatpush3.bf16.msra.mxu0 %v816_v21 }
  0x7b   :  { %707 = vmatprep.subr.bf16.mxu0 %v975_v0 }
  0x7e   :  { %708 = vmatpush3.bf16.msra.mxu0 %v817_v22 }
  0x7f   :  { %709 = vmatprep.subr.bf16.mxu0 %v975_v0 }
  0x82   :  { %710 = vmatpush3.bf16.msra.mxu0 %v818_v23 }
  0x83   :  { %711 = vmatprep.subr.bf16.mxu0 %v975_v0 }
  0x86   :  { %712 = vmatpush3.bf16.msra.mxu0 %v819_v32 }
  0x87   :  { %713 = vmatprep.subr.bf16.mxu0 %v975_v0 }
  0x8a   :  { %714 = vmatpush3.bf16.msra.mxu0 %v820_v33 }
 0x140   :  { %v198_v25 = vpop.f32.mrb[0].mxu0 }
 0x141   :  { %v199_v26 = vadd.f32 %v588_v24, %v198_v25  ;;  %v677_v27 = vpop.f32.mrb[1].mxu0 }
 0x142   :  { %v201_v28 = vpop.f32.mrb[2].mxu0 }
 0x143   :  { %v204_v29 = vmax.f32 %v199_v26, 0.0  ;;  %v678_v30 = vpop.f32.mrb[3].mxu0 }
 0x145   :  { %v205_v31 = vpack.c.bf16 %v204_v29, %v204_v29 }
 0x147   :  { %696 = vmatmul.mubr.bf16.vlgmr.msra.gmra.mrb[0].mxu1 %v205_v31 }
 0x148   :  { %751 = vmatprep.mubr.msk.f32.mxu1 %vm976_vm0, %v975_v0  ;;  %756 = vmatpush3.bf16.msra.mxu1 %v755_v46  ;;  %v445_v0 = vld [vmem:[#allocation8 + $0x50] sm:$0xff] }
 0x149   :  { %757 = vmatprep.subr.bf16.mxu1 %v977_v45  ;;  %v770_v2 = vpack.c.bf16 %v446_v1, %v445_v0 }
 0x14c   :  { %759 = vmatpush3.bf16.msra.mxu1 %v758_v48 }
 0x14d   :  { %760 = vmatprep.subr.bf16.mxu1 %v977_v45 }
 0x150   :  { %762 = vmatpush3.bf16.msra.mxu1 %v761_v51 }
 0x151   :  { %763 = vmatprep.subr.bf16.mxu1 %v977_v45 }
 0x154   :  { %765 = vmatpush3.bf16.msra.mxu1 %v764_v54 }
 0x155   :  { %766 = vmatprep.subr.bf16.mxu1 %v977_v45 }
 0x158   :  { %768 = vmatpush3.bf16.msra.mxu1 %v767_v63 }
 0x159   :  { %769 = vmatprep.subr.bf16.mxu1 %v977_v45 }
 0x15c   :  { %771 = vmatpush3.bf16.msra.mxu1 %v770_v2 }
 0x15d   :  { %772 = vmatprep.subr.bf16.mxu1 %v977_v45 }
 0x160   :  { %774 = vmatpush3.bf16.msra.mxu1 %v773_v5 }
 0x161   :  { %775 = vmatprep.subr.bf16.mxu1 %v977_v45 }
 0x164   :  { %777 = vmatpush3.bf16.msra.mxu1 %v776_v8 }
 0x21a   :  { %v311_v35 = vpop.f32.mrb[0].mxu1 }
 0x21b   :  { %v312_v36 = vadd.f32 %v597_v34, %v311_v35  ;;  %v697_v37 = vpop.f32.mrb[1].mxu1 }
 0x21c   :  { %v314_v38 = vpop.f32.mrb[2].mxu1 }
 0x21d   :  { %v317_v39 = vmax.f32 %v312_v36, 0.0  ;;  %v698_v40 = vpop.f32.mrb[3].mxu1 }
 0x21f   :  { %v318_v41 = vpack.c.bf16 %v317_v39, %v317_v39 }
 0x221   :  { %716 = vmatmul.mubr.bf16.vlgmr.msra.gmra.mrb[4].mxu0 %v318_v41 }
 0x2f4   :  { %v424_v56 = vpop.f32.mrb[4].mxu0 }
 0x2f5   :  { %v425_v57 = vadd.f32 %v606_v55, %v424_v56  ;;  %v717_v58 = vpop.f32.mrb[5].mxu0 }
 0x2f6   :  { %v427_v59 = vpop.f32.mrb[6].mxu0 }
 0x2f7   :  { %430 = vmax.xlane.f32.xlu0 %v425_v57  ;;  %v718_v60 = vpop.f32.mrb[7].mxu0 }
 0x384   :  { %v431_v9 = vpop.xlane.xlu0 %430 }
 0x385   :  { %v432_v10 = vsub.f32 %v425_v57, %v431_v9 }
 0x387   :  { %v433_v11 = vmul.f32 1.442695, %v432_v10 }
 0x389   :  { %821 = vpow2.f32 %v433_v11 }
 0x393   :  { %v822_v12 = vpop.eup %821 }
 0x394   :  { %752 = vmatmul.mubr.f32.vlgmr.msra.gmra.mrb[4].mxu1 %v822_v12 }
 0x467   :  { %v517_v15 = vpop.f32.mrb[4].mxu1 }
 0x468   :  { %530 = vrot.lane.b32.xlu0 %v517_v15, %s980_s6  ;;  %v753_v16 = vpop.f32.mrb[5].mxu1 }
 0x46c   :  { %523 = vperm.xlu0 %795, %v517_v15  }
 0x470   :  { %796 = vset.pattern.permute.xlu0 %v979_v14 }
 0x4da   :  { %v531_v18 = vpop.permute.xlu0 %530 }
 0x4db   :  { %v533_v19 = vmul.f32 %v531_v18, %v529_v17 }
 0x4dd   :  { %536 = vperm.xlu1 %794, %v533_v19  }
 0x4eb   :  { %v524_v20 = vpop.permute.xlu0 %523 }
 0x4ec   :  { %823 = vrcp.f32 %v524_v20 }
 0x4f6   :  { %v824_v21 = vpop.eup %823 }
 0x4f7   :  { %v527_v22 = vmul.f32 %v824_v21, %v822_v12 }
 0x4f9   :  { %528 = vst [vmem:[#allocation10] sm:$0xff] %v527_v22 }
 0x55c   :  { %v537_v23 = vpop.permute.xlu1 %536 }
 0x55d   :  { %vm539_vm1 = vcmp.lt.f32.partialorder %v517_v15, %v537_v23 }
 0x55e   :  { %v540_v24 = vsel %vm539_vm1, 1, %v979_v14 }
 0x55f   :  { %v542_v25 = vshrl.u32 %v540_v24, 16  ;;  %v541_v26 = vand.u32 65535, %v540_v24 }
 0x561   :  { %v544_v27 = vcvt.s32.f32 %v542_v25  ;;  %v543_v28 = vcvt.s32.f32 %v541_v26 }
 0x563   :  { %547 = vadd.xlane.f32.xlu1 %v544_v27  ;;  %545 = vadd.xlane.f32.xlu0 %v543_v28 }
 0x564   :  { %924 = shalt.err (!%p921_p8)
}
 0x565   :  { %s925_s12 = scalar_lea.hbm %s1189_s9, 128 }
 0x566   :  { %p926_p9 = scmp.ne.s32.totalorder %s1189_s9, %s925_s12  ;;  %p929_p10 = scmp.lt.u32.totalorder %s925_s12, %s1189_s9 }
 0x568   :  { %p931_p11 = pnand %p929_p10, %p926_p9 }
 0x56a   :  { %934 = shalt.err (!%p931_p11)
}
 0x56b   :  { %566 = dma.vmem_to_hbm [thread:$0]  %s564_s11, 128, %s1189_s9, [#allocation4]   ;;  %vm555_vm2 = vcmask 64512  }
 0x56c   :  { %s982_s19 = smov [#allocation11]  }
 0x56d   :  { %s573_s21 = sshll.u32 %s982_s19, 4  ;;  %s574_s21 = int_to_ptr.vmem [resolvable:$true] %s573_s21 }
 0x56e   :  { %s935_s5 = scalar_lea.vmem %s574_s21, 128  ;;  %p940_p13 = scmp.lt.s32.totalorder %s574_s21, %s574_s21 }
 0x56f   :  { %p936_p12 = scmp.ne.s32.totalorder %s574_s21, %s935_s5  ;;  %p941_p0 = scmp.lt.s32.totalorder %s935_s5, %s935_s5 }
 0x571   :  { %p942_p1 = por %p941_p0, %p940_p13 }
 0x573   :  { %p943_p2 = pnand %p942_p1, %p936_p12 }
 0x5f0   :  { %v548_v29 = vpop.xlane.xlu1 %547  ;;  %v546_v30 = vpop.xlane.xlu0 %545 }
 0x5f1   :  { %v550_v31 = vcvt.f32.s32 %v548_v29  ;;  %v549_v33 = vcvt.f32.s32 %v546_v30 }
 0x5f3   :  { %v551_v32 = vshll.u32 %v550_v31, 16 }
 0x5f5   :  { %v552_v34 = vadd.s32 %v551_v32, %v549_v33 }
 0x5f7   :  { %vm553_vm3 = vcmp.lt.s32.totalorder %v552_v34, 5 }
 0x5f8   :  { %v554_v35 = vsel %vm553_vm3, %v552_v34, 5 }
 0x5f9   :  { %556 = vst.msk [vmem:[#allocation11] sm:$0xff] %vm555_vm2, %v554_v35 }
 0x5fa   :  { %946 = shalt.err (!%p943_p2)
}
 0x5fb   :  { %s947_s26 = scalar_lea.hbm %s1190_s10, 128 }
 0x5fc   :  { %p948_p3 = scmp.ne.s32.totalorder %s1190_s10, %s947_s26  ;;  %p951_p4 = scmp.lt.u32.totalorder %s947_s26, %s1190_s10 }
 0x5fe   :  { %p953_p5 = pnand %p951_p4, %p948_p3 }
 0x600   :  { %956 = shalt.err (!%p953_p5)
}
 0x601   :  { %576 = dma.vmem_to_hbm [thread:$0]  %s574_s21, 128, %s1190_s10, [#allocation12]  }
 0x602   :  { %963 = dma.done.wait [#allocation4], 128  }
 0x603   :  { %964 = vsyncadd [#allocation4], 4294967168 }
 0x604   :  { %965 = dma.done.wait [#allocation12], 128  }
 0x605   :  { %966 = vsyncadd [#allocation12], 4294967168 }
 0x606   :  { %583 = vsyncpa [#allocation3], 1 }
 0x607   :  { %584 = vsyncpa [#allocation6], 1 }
 0x608   :  { %585 = vsyncpa [#allocation9], 1 }
 0x609   :  { %586 = vsyncpa [#allocation4], 1 }
 0x60a   :  { %587 = vsyncpa [#allocation12], 1 }

</bundles_post_ra>
